<compile_context>
chip_gen: v7x
topology: tpu7x:2x2x1
jax: 0.10.0
libtpu: 0.0.40
codegen_flags: <defaults>
</compile_context>

<pallas_src>
import jax
import jax.numpy as jnp
from jax.experimental import pallas as pl
from jax.experimental.pallas import tpu as pltpu


def _gemv_kernel(x_ref, w_ref, b_ref, o_ref, acc_ref):
    """One (tm, tk) tile of y = x @ w^T + b, with w passed as a (1, tk) row."""
    k = pl.program_id(1)

    @pl.when(k == 0)
    def _init():
        acc_ref[...] = jnp.zeros_like(acc_ref)

    # VPU multiply + XLU lane-reduce; accumulate in f32 regardless of streaming dtype.
    x = x_ref[...].astype(jnp.float32)
    w = w_ref[...].astype(jnp.float32)
    acc_ref[...] += jnp.sum(x * w, axis=-1, keepdims=True)

    @pl.when(k == pl.num_programs(1) - 1)
    def _finalize():
        o_ref[...] = (acc_ref[...] + b_ref[0, 0]).astype(o_ref.dtype)


def _round_up(n: int, m: int) -> int:
    return ((n + m - 1) // m) * m


def mock_model_forward(x, weight, bias, *, tm=512, tk=512):
    """Pallas equivalent of MockModel.forward (uncertainty_method=None).

    x:      (B, A, L)  activation, streamed in its native dtype (bf16 halves HBM traffic)
    weight: (1, A*L)   PyTorch nn.Linear layout, used directly as a row (no transpose)
    bias:   (1,)
    returns (B, 1) in x's dtype
    """
    B = x.shape[0]
    x_flat = x.reshape(B, -1)            # flatten(start_dim=1) -> (B, D)
    D = x_flat.shape[1]
    act_dtype = x_flat.dtype
    itemsize = jnp.dtype(act_dtype).itemsize

    # Row tile: multiple of 8 (sublanes); K tile: multiple of 128 (lanes).
    # Small problems clamp to full extents (full-extent blocks bypass the (8,128) rule).
    tm = B if B <= tm else tm
    tk = D if D <= tk else tk

    # Pad so tiles divide exactly. Zero padding is exact for a sum reduction; padded
    # rows are sliced off afterwards. No-op for aligned / small shapes.
    Bp = _round_up(B, tm)
    Dp = _round_up(D, tk)
    w_row = weight.reshape(1, D)
    if Dp != D:
        x_flat = jnp.pad(x_flat, ((0, 0), (0, Dp - D)))
        w_row = jnp.pad(w_row, ((0, 0), (0, Dp - D)))
    if Bp != B:
        x_flat = jnp.pad(x_flat, ((0, Bp - B), (0, 0)))

    b_smem = bias.reshape(1, 1).astype(jnp.float32)

    # VMEM budget: double-buffered x + w tiles, f32 accumulator, double-buffered output.
    w_itemsize = jnp.dtype(w_row.dtype).itemsize
    tile_bytes = 2 * tm * tk * itemsize + 2 * tk * w_itemsize + tm * 4 + 2 * tm * 4
    vmem_limit = int(min(48 * 1024 * 1024, max(16 * 1024 * 1024, 4 * tile_bytes)))

    out = pl.pallas_call(
        _gemv_kernel,
        out_shape=jax.ShapeDtypeStruct((Bp, 1), act_dtype),
        grid_spec=pltpu.PrefetchScalarGridSpec(
            num_scalar_prefetch=0,
            grid=(Bp // tm, Dp // tk),                              # reduction axis last
            in_specs=[
                pl.BlockSpec((tm, tk), lambda i, k: (i, k)),        # x tiles
                pl.BlockSpec((1, tk), lambda i, k: (0, k)),         # weight row tiles
                pl.BlockSpec(memory_space=pltpu.MemorySpace.SMEM),  # bias scalar in SMEM
            ],
            out_specs=pl.BlockSpec((tm, 1), lambda i, k: (i, 0)),   # resident across K
            scratch_shapes=[pltpu.VMEM((tm, 1), jnp.float32)],      # f32 accumulator
        ),
        compiler_params=pltpu.CompilerParams(
            dimension_semantics=("parallel", "arbitrary"),
            vmem_limit_bytes=vmem_limit,
        ),
        cost_estimate=pl.CostEstimate(
            flops=2 * B * D,
            transcendentals=0,
            bytes_accessed=int(B * D * itemsize + D * w_itemsize + B * itemsize + 4),
        ),
    )(x_flat, w_row, b_smem)

    return out[:B]


if __name__ == "__main__":
    key = jax.random.PRNGKey(0)
    kx, kw, kb, kx2 = jax.random.split(key, 4)

    # ---- Case 1: small shapes consistent with the module: MockModel(A=4, L=8), batch=2.
    A, L, B = 4, 8, 2
    D = A * L

    # Deterministic parameter init (mimics nn.Linear uniform(-1/sqrt(D), 1/sqrt(D))).
    bound = 1.0 / jnp.sqrt(jnp.float32(D))
    weight = jax.random.uniform(kw, (1, D), jnp.float32, -bound, bound)
    bias = jax.random.uniform(kb, (1,), jnp.float32, -bound, bound)
    x = jax.random.normal(kx, (B, A, L), jnp.float32)

    fwd = jax.jit(mock_model_forward, static_argnames=("tm", "tk"))
    y = jax.block_until_ready(fwd(x, weight, bias))

    y_ref = x.reshape(B, -1) @ weight.T + bias
    assert y.shape == (B, 1)
    assert jnp.allclose(y, y_ref, atol=1e-5, rtol=1e-5), (y, y_ref)

    # ---- Case 2: unaligned shapes with small tiles to exercise the padded multi-tile grid.
    A2, L2, B2 = 4, 96, 20            # D2 = 384, B2 = 20 -> pads to (24, 384), grid (3, 3)
    D2 = A2 * L2
    x2 = jax.random.normal(kx2, (B2, A2, L2), jnp.float32)
    w2 = jax.random.uniform(kw, (1, D2), jnp.float32, -bound, bound)
    b2 = jax.random.uniform(kb, (1,), jnp.float32, -bound, bound)
    y2 = jax.block_until_ready(fwd(x2, w2, b2, tm=8, tk=128))
    y2_ref = x2.reshape(B2, -1) @ w2.T + b2
    assert y2.shape == (B2, 1)
    assert jnp.allclose(y2, y2_ref, atol=1e-5, rtol=1e-5), (y2, y2_ref)

    # TODO(synk): 'ensemble' branch = mean of 10 linear heads, which is itself linear —
    # reuse this kernel with averaged weights (or a fused (10, D) weight stack padded to
    # a lane-dense 128-wide output for one-pass HBM streaming); 'dropout' branch is an
    # eval-time identity / train-time stochastic mask and is not kernelized here.
    print("KERNEL_OK")
</pallas_src>

<mosaic_0001>
module attributes {stable_mosaic.version = 11 : i64} {
  func.func @_gemv_kernel(%arg0: i32, %arg1: i32, %arg2: memref<2x32xf32, #tpu.memory_space<vmem>>, %arg3: memref<1x32xf32, #tpu.memory_space<vmem>>, %arg4: memref<1x1xf32, #tpu.memory_space<smem>>, %arg5: memref<2x1xf32, #tpu.memory_space<vmem>>, %arg6: memref<2x1xf32, #tpu.memory_space<vmem>>) attributes {dimension_semantics = [#tpu.dimension_semantics<parallel>, #tpu.dimension_semantics<arbitrary>], iteration_bounds = array<i64: 1, 1>, scalar_prefetch = 0 : i64, scratch_operands = 1 : i64, tpu.core_type = #tpu.core_type<tc>, window_params = [{transform_indices = @transform_0, window_bounds = array<i64: 2, 32>}, {transform_indices = @transform_1, window_bounds = array<i64: 1, 32>}, {transform_indices = @transform_2, window_bounds = array<i64: 1, 1>}, {transform_indices = @transform_3, window_bounds = array<i64: 2, 1>}]} {
    %c0_i32 = arith.constant 0 : i32
    %0 = arith.cmpi eq, %arg1, %c0_i32 : i32
    %1 = arith.extui %0 : i1 to i32
    %c0_i32_0 = arith.constant 0 : i32
    %2 = arith.cmpi ne, %1, %c0_i32_0 : i32
    scf.if %2 {
      %cst_10 = arith.constant 0.000000e+00 : f32
      %15 = vector.broadcast %cst_10 : f32 to vector<2x1xf32>
      %c0_11 = arith.constant 0 : index
      %c0_12 = arith.constant 0 : index
      %16 = vector.load %arg6[%c0_11, %c0_12] : memref<2x1xf32, #tpu.memory_space<vmem>>, vector<2x1xf32>
      tpu.vector_store %arg6[%c0_11, %c0_12], %15 {strides = array<i32>} : memref<2x1xf32, #tpu.memory_space<vmem>>, vector<2x1xf32>,
    } else {
    }
    %c0 = arith.constant 0 : index
    %c0_1 = arith.constant 0 : index
    %3 = vector.load %arg2[%c0, %c0_1] : memref<2x32xf32, #tpu.memory_space<vmem>>, vector<2x32xf32>
    %c0_2 = arith.constant 0 : index
    %c0_3 = arith.constant 0 : index
    %4 = vector.load %arg3[%c0_2, %c0_3] : memref<1x32xf32, #tpu.memory_space<vmem>>, vector<1x32xf32>
    %c0_4 = arith.constant 0 : index
    %c0_5 = arith.constant 0 : index
    %5 = vector.load %arg6[%c0_4, %c0_5] : memref<2x1xf32, #tpu.memory_space<vmem>>, vector<2x1xf32>
    %6 = vector.broadcast %4 : vector<1x32xf32> to vector<2x32xf32>
    %7 = arith.mulf %3, %6 : vector<2x32xf32>
    %cst = arith.constant dense<0.000000e+00> : vector<2xf32>
    %8 = vector.multi_reduction <add>, %7, %cst [1] : vector<2x32xf32> to vector<2xf32>
    %9 = vector.shape_cast %8 : vector<2xf32> to vector<2x1xf32>
    %10 = arith.addf %5, %9 : vector<2x1xf32>
    %c0_6 = arith.constant 0 : index
    %c0_7 = arith.constant 0 : index
    %11 = vector.load %arg6[%c0_6, %c0_7] : memref<2x1xf32, #tpu.memory_space<vmem>>, vector<2x1xf32>
    tpu.vector_store %arg6[%c0_6, %c0_7], %10 {strides = array<i32>} : memref<2x1xf32, #tpu.memory_space<vmem>>, vector<2x1xf32>,
    %c0_i32_8 = arith.constant 0 : i32
    %12 = arith.cmpi eq, %arg1, %c0_i32_8 : i32
    %13 = arith.extui %12 : i1 to i32
    %c0_i32_9 = arith.constant 0 : i32
    %14 = arith.cmpi ne, %13, %c0_i32_9 : i32
    scf.if %14 {
      %c0_10 = arith.constant 0 : index
      %c0_11 = arith.constant 0 : index
      %15 = vector.load %arg6[%c0_10, %c0_11] : memref<2x1xf32, #tpu.memory_space<vmem>>, vector<2x1xf32>
      %c0_12 = arith.constant 0 : index
      %c0_13 = arith.constant 0 : index
      %16 = memref.load %arg4[%c0_12, %c0_13] : memref<1x1xf32, #tpu.memory_space<smem>>
      %17 = vector.broadcast %16 : f32 to vector<2x1xf32>
      %18 = arith.addf %15, %17 : vector<2x1xf32>
      %c0_14 = arith.constant 0 : index
      %c0_15 = arith.constant 0 : index
      %19 = vector.load %arg5[%c0_14, %c0_15] : memref<2x1xf32, #tpu.memory_space<vmem>>, vector<2x1xf32>
      tpu.vector_store %arg5[%c0_14, %c0_15], %18 {strides = array<i32>} : memref<2x1xf32, #tpu.memory_space<vmem>>, vector<2x1xf32>,
    } else {
    }
    return
  }
  func.func @transform_0(%arg0: i32, %arg1: i32) -> (i32, i32) {
    %c0_i32 = arith.constant 0 : i32
    return %arg0, %arg1 : i32, i32
  }
  func.func @transform_1(%arg0: i32, %arg1: i32) -> (i32, i32) {
    %c0_i32 = arith.constant 0 : i32
    %c0_i32_0 = arith.constant 0 : i32
    return %c0_i32, %arg1 : i32, i32
  }
  func.func @transform_2(%arg0: i32, %arg1: i32) -> (i32, i32) {
    %c0_i32 = arith.constant 0 : i32
    %c0_i32_0 = arith.constant 0 : i32
    %c0_i32_1 = arith.constant 0 : i32
    return %c0_i32, %c0_i32_0 : i32, i32
  }
  func.func @transform_3(%arg0: i32, %arg1: i32) -> (i32, i32) {
    %c0_i32 = arith.constant 0 : i32
    %c0_i32_0 = arith.constant 0 : i32
    return %arg0, %c0_i32 : i32, i32
  }
}

</mosaic_0001>

<bundles_post_ra>
// kernel: mock_model_forward.1
= control target key start
LH: loop header
LB: loop body
LE: loop exit
PB: predicated region body
PF: predicated region fallthrough
CT: control target
= control target key end

     0   :  { %vm19_vm0 = vcmask 1024   ;;  %vm31_vm1 = vcmask 254976   ;;  %v52_v2 = vmov 0.0   ;;  %s88_s0 = inlined_call_operand.vmem [shape: f32[2,32], index: 0, kind: input, shape index: {}]   ;;  %s89_s1 = inlined_call_operand.vmem [shape: f32[1,32], index: 1, kind: input, shape index: {}]   ;;  %s90_s2 = inlined_call_operand.<no memory space> [shape: f32[1,1], index: 2, kind: input, shape index: {}]   ;;  %s91_s3 = inlined_call_operand.vmem [shape: f32[2,1], index: 3, kind: output, shape index: {}]  }
   0x1   :  { %v21_v0 = vld [vmem:[%s88_s0] sm:$0x3]  ;;  %20 = vst.msk [vmem:[#allocation2] sm:$0x3] %vm19_vm0, %v52_v2  ;;  %v43_v8 = vstv %s90_s2 }
   0x2   :  { %v50_v1 = vld [vmem:[%s89_s1] ss:$0 sm:$0xff] }
   0x3   :  { %v30_v3 = vmul.f32 %v50_v1, %v21_v0 }
   0x5   :  { %v32_v4 = vsel %vm31_vm1, %v30_v3, 0.0 }
   0x6   :  { %33 = vadd.xlane.f32.xlu0 %v32_v4 }
   0x8   :  { %v23_v5 = vld [vmem:[#allocation2] sm:$0x3] }
  0x93   :  { %v34_v6 = vpop.xlane.xlu0 %33 }
  0x94   :  { %v35_v7 = vadd.f32 %v34_v6, %v23_v5 }
  0x96   :  { %37 = vst.msk [vmem:[#allocation2] sm:$0x3] %vm19_vm0, %v35_v7 }
  0x9d   :  { %v41_v9 = vld [vmem:[#allocation2] sm:$0x3] }
  0x9e   :  { %v44_v10 = vadd.f32 %v43_v8, %v41_v9 }
  0xa0   :  { %45 = vst.msk [vmem:[%s91_s3] sm:$0x3] %vm19_vm0, %v44_v10 }

</bundles_post_ra>
